<compile_context>
chip_gen: v7x
topology: tpu7x:2x2x1
jax: 0.10.0
libtpu: 0.0.40
codegen_flags: <defaults>
</compile_context>

<pallas_src>
import jax
import jax.numpy as jnp
from jax import lax
from jax.experimental import pallas as pl
from jax.experimental.pallas import tpu as pltpu

IN, H1, H2 = 3, 50, 10
CHUNK = 512                      # lanes per inner iteration (h1 = 28 vregs)

# Packed parameter buffer: (80, 128) f32.  MXU operands start at lane 0 of an
# 8-aligned sublane band; biases/w3 sit at fixed small lane offsets nearby.
_PACK_SHAPE = (80, 128)
_W1_R, _W1_C = 0, 0              # w1^T : rows  0:50, lanes 0:3
_B1_R, _B1_C = 0, 4              # b1   : rows  0:50, lane  4
_W2_R, _W2_C = 56, 0             # w2^T : rows 56:66, lanes 0:50
_B2_R, _B2_C = 56, 56            # b2   : rows 56:66, lane 56
_W3_R, _W3_C = 56, 58            # w3   : rows 56:66, lane 58
_B3_R, _B3_C = 72, 0             # b3   : row  72,    lane  0


def deadbeat_kernel(x_ref, p_ref, o_ref):
    # x_ref: (TILE, 3)  natural-layout batch tile
    # p_ref: (80, 128)  packed params (constant index_map -> VMEM resident)
    # o_ref: (1, TILE)  lane-dense output tile
    # Parameter slices hoisted out of the chunk loop (loop-invariant).
    w1t = p_ref[_W1_R:_W1_R + H1, _W1_C:_W1_C + IN]      # (50, 3)
    b1 = p_ref[_B1_R:_B1_R + H1, _B1_C:_B1_C + 1]        # (50, 1)
    w2t = p_ref[_W2_R:_W2_R + H2, _W2_C:_W2_C + H1]      # (10, 50)
    b2 = p_ref[_B2_R:_B2_R + H2, _B2_C:_B2_C + 1]        # (10, 1)
    w3 = p_ref[_W3_R:_W3_R + H2, _W3_C:_W3_C + 1]        # (10, 1)
    b3 = p_ref[_B3_R:_B3_R + 1, _B3_C:_B3_C + 1]         # (1, 1)

    tile = x_ref.shape[0]
    chunk = min(CHUNK, tile)
    # Fully static (unrolled) chunk loop: intermediates die every iteration,
    # nothing is carried, so compute stays vreg-resident per chunk.
    for c in range(tile // chunk):
        r0 = c * chunk
        xc = x_ref[r0:r0 + chunk, :]                      # (chunk, 3)
        # Layer 1 on the MXU, contracting both last dims -> lane-dense
        # (50, chunk); the (chunk, 3) operand transpose goes to the XLU.
        h1 = lax.dot_general(w1t, xc, (((1,), (1,)), ((), ())),
                             preferred_element_type=jnp.float32)
        h1 = jnp.maximum(h1 + b1, 0.0)                    # (50, chunk)
        # Layer 2 on the MXU.
        h2 = jnp.dot(w2t, h1, preferred_element_type=jnp.float32) + b2
        h2 = jnp.maximum(h2, 0.0)                         # (10, chunk)
        # Layer 3 (10 -> 1) on the VPU + sublane reduce (XLU): no 1-lane-wide
        # MXU pass.
        out = jnp.sum(h2 * w3, axis=0, keepdims=True) + b3
        o_ref[:, r0:r0 + chunk] = out.astype(o_ref.dtype)


def pack_params(params):
    """Pack all weights/biases (pre-transposed for batch-in-lanes compute)."""
    w1, b1, w2, b2, w3, b3 = params
    p = jnp.zeros(_PACK_SHAPE, jnp.float32)
    p = p.at[_W1_R:_W1_R + H1, _W1_C:_W1_C + IN].set(w1.T.astype(jnp.float32))
    p = p.at[_B1_R:_B1_R + H1, _B1_C:_B1_C + 1].set(b1.reshape(H1, 1).astype(jnp.float32))
    p = p.at[_W2_R:_W2_R + H2, _W2_C:_W2_C + H1].set(w2.T.astype(jnp.float32))
    p = p.at[_B2_R:_B2_R + H2, _B2_C:_B2_C + 1].set(b2.reshape(H2, 1).astype(jnp.float32))
    p = p.at[_W3_R:_W3_R + H2, _W3_C:_W3_C + 1].set(w3.reshape(H2, 1).astype(jnp.float32))
    p = p.at[_B3_R:_B3_R + 1, _B3_C:_B3_C + 1].set(b3.reshape(1, 1).astype(jnp.float32))
    return p


def _round_up(a, m):
    return ((a + m - 1) // m) * m


def deadbeat_net(x, params, tile=8192):
    n = x.shape[0]
    n_min = _round_up(max(n, 1), 128)            # lane-aligned minimum extent
    if n_min <= CHUNK:
        tile = n_min                             # one small tile (chunk == tile)
    else:
        # Requested tile, rounded to a CHUNK multiple and never over-padding.
        tile = max(CHUNK, (min(tile, _round_up(n_min, CHUNK)) // CHUNK) * CHUNK)
        # Keep >= 2 grid steps when the batch allows, so v7x's two TensorCores
        # both get work ("parallel" axis); no effect on single-TC v5e/v6e.
        half = _round_up((n_min + 1) // 2, CHUNK)
        if tile > half:
            tile = half
    n_pad = _round_up(n, tile)
    grid = (n_pad // tile,)

    xp = x.astype(jnp.float32)
    if n_pad != n:
        xp = jnp.pad(xp, ((0, n_pad - n), (0, 0)))    # pad only; no transpose

    packed = pack_params(params)

    out_row = pl.pallas_call(
        deadbeat_kernel,
        out_shape=jax.ShapeDtypeStruct((1, n_pad), jnp.float32),
        grid=grid,
        in_specs=[
            pl.BlockSpec((tile, IN), lambda i: (i, 0)),       # x: natural layout
            pl.BlockSpec(_PACK_SHAPE, lambda i: (0, 0)),      # params: resident
        ],
        out_specs=pl.BlockSpec((1, tile), lambda i: (0, i)),  # lane-dense output
        compiler_params=pltpu.CompilerParams(
            dimension_semantics=("parallel",),        # megacore / 2-TC sharding
            vmem_limit_bytes=32 * 1024 * 1024,        # explicit: v5e default is 16 MiB
        ),
    )(xp, packed)

    # Padded rows produce relu(b1)-derived values; sliced off here.
    return out_row[:, :n].reshape(n, 1)


def init_params(key):
    # Deterministic init mirroring nn.Linear shapes: Linear(3,50), Linear(50,10),
    # Linear(10,1), stored as (in, out) so the reference computes x @ W + b.
    ks = jax.random.split(key, 6)

    def uniform(k, shape, fan_in):
        bound = 1.0 / jnp.sqrt(fan_in)
        return jax.random.uniform(k, shape, jnp.float32, -bound, bound)

    w1 = uniform(ks[0], (3, 50), 3.0)
    b1 = uniform(ks[1], (1, 50), 3.0)
    w2 = uniform(ks[2], (50, 10), 50.0)
    b2 = uniform(ks[3], (1, 10), 50.0)
    w3 = uniform(ks[4], (10, 1), 10.0)
    b3 = uniform(ks[5], (1, 1), 10.0)
    return w1, b1, w2, b2, w3, b3


def reference(x, params):
    w1, b1, w2, b2, w3, b3 = params
    h1 = jnp.maximum(x @ w1 + b1, 0.0)
    h2 = jnp.maximum(h1 @ w2 + b2, 0.0)
    return h2 @ w3 + b3


if __name__ == "__main__":
    key = jax.random.PRNGKey(0)
    k_x, k_p, k_x2, k_x3 = jax.random.split(key, 4)
    params = init_params(k_p)

    # Small batch, matching the module spec (in_features=3).
    x = jax.random.normal(k_x, (8, 3), jnp.float32)
    out = jax.block_until_ready(deadbeat_net(x, params))
    ref = reference(x, params)
    assert out.shape == (8, 1), out.shape
    assert jnp.allclose(out, ref, atol=1e-4, rtol=1e-4)

    # Non-tile-multiple batch: exercises the padded, 2-step grid path.
    x2 = jax.random.normal(k_x2, (1000, 3), jnp.float32)
    out2 = jax.block_until_ready(deadbeat_net(x2, params))
    ref2 = reference(x2, params)
    assert out2.shape == (1000, 1), out2.shape
    assert jnp.allclose(out2, ref2, atol=1e-4, rtol=1e-4)

    # Larger batch: exercises the 8192-row tile and the 16-chunk inner loop.
    x3 = jax.random.normal(k_x3, (20000, 3), jnp.float32)
    out3 = jax.block_until_ready(deadbeat_net(x3, params))
    ref3 = reference(x3, params)
    assert out3.shape == (20000, 1), out3.shape
    assert jnp.allclose(out3, ref3, atol=1e-4, rtol=1e-4)

    print("KERNEL_OK")
</pallas_src>

<mosaic_0001>
module attributes {stable_mosaic.version = 11 : i64} {
  func.func @deadbeat_kernel(%arg0: i32, %arg1: memref<128x3xf32, #tpu.memory_space<vmem>>, %arg2: memref<80x128xf32, #tpu.memory_space<vmem>>, %arg3: memref<1x128xf32, #tpu.memory_space<vmem>>) attributes {dimension_semantics = [#tpu.dimension_semantics<parallel>], iteration_bounds = array<i64: 1>, scalar_prefetch = 0 : i64, scratch_operands = 0 : i64, tpu.core_type = #tpu.core_type<tc>, window_params = [{transform_indices = @transform_0, window_bounds = array<i64: 128, 3>}, {pipeline_mode = #tpu.pipeline_mode<synchronous>, transform_indices = @transform_1, window_bounds = array<i64: 80, 128>}, {transform_indices = @transform_2, window_bounds = array<i64: 1, 128>}]} {
    %c0 = arith.constant 0 : index
    %c0_0 = arith.constant 0 : index
    %0 = vector.load %arg2[%c0, %c0_0] : memref<80x128xf32, #tpu.memory_space<vmem>>, vector<50x3xf32>
    %c0_1 = arith.constant 0 : index
    %c4 = arith.constant 4 : index
    %1 = vector.load %arg2[%c0_1, %c4] : memref<80x128xf32, #tpu.memory_space<vmem>>, vector<50x1xf32>
    %c56 = arith.constant 56 : index
    %c0_2 = arith.constant 0 : index
    %2 = vector.load %arg2[%c56, %c0_2] : memref<80x128xf32, #tpu.memory_space<vmem>>, vector<10x50xf32>
    %c56_3 = arith.constant 56 : index
    %c56_4 = arith.constant 56 : index
    %3 = vector.load %arg2[%c56_3, %c56_4] : memref<80x128xf32, #tpu.memory_space<vmem>>, vector<10x1xf32>
    %c56_5 = arith.constant 56 : index
    %c58 = arith.constant 58 : index
    %4 = vector.load %arg2[%c56_5, %c58] : memref<80x128xf32, #tpu.memory_space<vmem>>, vector<10x1xf32>
    %c72 = arith.constant 72 : index
    %c0_6 = arith.constant 0 : index
    %5 = vector.load %arg2[%c72, %c0_6] : memref<80x128xf32, #tpu.memory_space<vmem>>, vector<1x1xf32>
    %c0_7 = arith.constant 0 : index
    %c0_8 = arith.constant 0 : index
    %6 = vector.load %arg1[%c0_7, %c0_8] : memref<128x3xf32, #tpu.memory_space<vmem>>, vector<128x3xf32>
    %cst = arith.constant dense<0.000000e+00> : vector<50x128xf32>
    %7 = tpu.matmul %0, %6, %cst {dimension_numbers = #tpu.dot_dimension_numbers<[1], [1], [0], [0], [0, 0, 1, 0], [], []>} : vector<50x3xf32>, vector<128x3xf32>, vector<50x128xf32> -> vector<50x128xf32>
    %8 = vector.broadcast %1 : vector<50x1xf32> to vector<50x128xf32>
    %9 = arith.addf %7, %8 : vector<50x128xf32>
    %cst_9 = arith.constant 0.000000e+00 : f32
    %10 = vector.broadcast %cst_9 : f32 to vector<50x128xf32>
    %11 = arith.maximumf %9, %10 : vector<50x128xf32>
    %cst_10 = arith.constant dense<0.000000e+00> : vector<10x128xf32>
    %12 = tpu.matmul %2, %11, %cst_10 {dimension_numbers = #tpu.dot_dimension_numbers<[1], [0], [0], [1], [0, 0, 1, 1], [], []>} : vector<10x50xf32>, vector<50x128xf32>, vector<10x128xf32> -> vector<10x128xf32>
    %13 = vector.broadcast %3 : vector<10x1xf32> to vector<10x128xf32>
    %14 = arith.addf %12, %13 : vector<10x128xf32>
    %cst_11 = arith.constant 0.000000e+00 : f32
    %15 = vector.broadcast %cst_11 : f32 to vector<10x128xf32>
    %16 = arith.maximumf %14, %15 : vector<10x128xf32>
    %17 = vector.broadcast %4 : vector<10x1xf32> to vector<10x128xf32>
    %18 = arith.mulf %16, %17 : vector<10x128xf32>
    %cst_12 = arith.constant dense<0.000000e+00> : vector<128xf32>
    %19 = vector.multi_reduction <add>, %18, %cst_12 [0] : vector<10x128xf32> to vector<128xf32>
    %20 = vector.shape_cast %19 : vector<128xf32> to vector<1x128xf32>
    %21 = vector.broadcast %5 : vector<1x1xf32> to vector<1x128xf32>
    %22 = arith.addf %20, %21 : vector<1x128xf32>
    %c0_13 = arith.constant 0 : index
    %c0_14 = arith.constant 0 : index
    %23 = vector.load %arg3[%c0_13, %c0_14] : memref<1x128xf32, #tpu.memory_space<vmem>>, vector<1x128xf32>
    tpu.vector_store %arg3[%c0_13, %c0_14], %22 {strides = array<i32>} : memref<1x128xf32, #tpu.memory_space<vmem>>, vector<1x128xf32>,
    return
  }
  func.func @transform_0(%arg0: i32) -> (i32, i32) {
    %c0_i32 = arith.constant 0 : i32
    %c0_i32_0 = arith.constant 0 : i32
    return %arg0, %c0_i32 : i32, i32
  }
  func.func @transform_1(%arg0: i32) -> (i32, i32) {
    %c0_i32 = arith.constant 0 : i32
    %c0_i32_0 = arith.constant 0 : i32
    %c0_i32_1 = arith.constant 0 : i32
    return %c0_i32, %c0_i32_0 : i32, i32
  }
  func.func @transform_2(%arg0: i32) -> (i32, i32) {
    %c0_i32 = arith.constant 0 : i32
    %c0_i32_0 = arith.constant 0 : i32
    return %c0_i32, %arg0 : i32, i32
  }
}

</mosaic_0001>

<bundles_post_ra>
// kernel: tpu_custom_call.1
= control target key start
LH: loop header
LB: loop body
LE: loop exit
PB: predicated region body
PF: predicated region fallthrough
CT: control target
= control target key end

     0   :  { %vm73_vm0 = vcmask 23552   ;;  %v588_v2 = vmov 0.0|0.0   ;;  %vm589_vm2 = vmmov 0   ;;  %v590_v5 = vmov 0.0   ;;  %s749_s0 = inlined_call_operand.vmem [shape: f32[128,3], index: 0, kind: input, shape index: {}]   ;;  %s750_s1 = inlined_call_operand.vmem [shape: f32[80,128], index: 1, kind: input, shape index: {}]   ;;  %s751_s2 = inlined_call_operand.hbm [shape: f32[1,128], index: 2, kind: output, shape index: {}]  }
   0x1   :  { %v22_v0 = vld [vmem:[%s749_s0] sm:$0xff]  ;;  %v23_v1 = vld [vmem:[%s749_s0 + $0x8] sm:$0xff]  ;;  %506 = vmatprep.subr.bf16.mxu0 %v588_v2  ;;  %vm619_vm1 = vmpackc.low %vm73_vm0, %vm73_vm0  ;;  %468 = vmatprep.mubr.msk.f32.mxu0 %vm589_vm2, %v590_v5  ;;  %v591_v6 = vmov 4  }
   0x2   :  { %v507_v3 = vpack.c.bf16 %v23_v1, %v22_v0  ;;  %558 = vset.pattern.permute.xlu0 %v591_v6  ;;  %559 = vset.pattern.permute.xlu1 %v591_v6  ;;  %v24_v7 = vld [vmem:[%s749_s0 + $0x10] sm:$0xff]  ;;  %v25_v8 = vld [vmem:[%s749_s0 + $0x18] sm:$0xff]  ;;  %v12_v9 = vld [vmem:[%s750_s1] sm:$0xff] }
   0x3   :  { %v14_v10 = vld [vmem:[%s750_s1 + $0x10] sm:$0xff]  ;;  %40 = vperm.xlu0 %558, %v12_v9   ;;  %v511_v11 = vpack.c.bf16 %v25_v8, %v24_v7 }
   0x4   :  { %509 = vmatpush3.bf16.xpose.msk.msra.mxu0 %vm619_vm1, %v507_v3  ;;  %50 = vperm.xlu1 %559, %v14_v10  }
   0x5   :  { %510 = vmatprep.subr.bf16.mxu0 %v588_v2 }
   0x6   :  { %7 = vsyncpa [#allocation3], 0  ;;  %v13_v12 = vld [vmem:[%s750_s1 + $0x8] sm:$0xff]  ;;  %v15_v13 = vld [vmem:[%s750_s1 + $0x18] sm:$0xff]  ;;  %vm253_vm3 = vcmask 408576   ;;  %v592_v37 = vmov 56  }
   0x7   :  { %45 = vperm.xlu0 %558, %v13_v12   ;;  %v26_v14 = vld [vmem:[%s749_s0 + $0x20] sm:$0xff]  ;;  %v27_v15 = vld [vmem:[%s749_s0 + $0x28] sm:$0xff]  ;;  %v18_v19 = vld [vmem:[%s750_s1 + $0x30] sm:$0x3]  ;;  %v593_v39 = vmov 58   ;;  %v594_v40 = vmov 0  }
   0x8   :  { %55 = vperm.xlu1 %559, %v15_v13   ;;  %v16_v16 = vld [vmem:[%s750_s1 + $0x20] sm:$0xff]  ;;  %v17_v17 = vld [vmem:[%s750_s1 + $0x28] sm:$0xff]  ;;  %v515_v18 = vpack.c.bf16 %v27_v15, %v26_v14  ;;  %v28_v20 = vld [vmem:[%s749_s0 + $0x30] sm:$0xff]  ;;  %vm258_vm4 = vcmask 1041408  }
   0x9   :  { %v29_v21 = vld [vmem:[%s749_s0 + $0x38] sm:$0xff]  ;;  %v30_v23 = vld [vmem:[%s749_s0 + $0x40] sm:$0xff]  ;;  %v31_v24 = vld [vmem:[%s749_s0 + $0x48] sm:$0xff] }
   0xa   :  { %v519_v22 = vpack.c.bf16 %v29_v21, %v28_v20  ;;  %v523_v25 = vpack.c.bf16 %v31_v24, %v30_v23  ;;  %v32_v26 = vld [vmem:[%s749_s0 + $0x50] sm:$0xff]  ;;  %v33_v27 = vld [vmem:[%s749_s0 + $0x58] sm:$0xff]  ;;  %v34_v29 = vld [vmem:[%s749_s0 + $0x60] sm:$0xff] }
   0xb   :  { %60 = vperm.xlu0 %558, %v16_v16   ;;  %v527_v28 = vpack.c.bf16 %v33_v27, %v32_v26  ;;  %v35_v30 = vld [vmem:[%s749_s0 + $0x68] sm:$0xff]  ;;  %v36_v32 = vld [vmem:[%s749_s0 + $0x70] sm:$0xff]  ;;  %v37_v33 = vld [vmem:[%s749_s0 + $0x78] sm:$0xff] }
   0xc   :  { %513 = vmatpush3.bf16.xpose.msk.msra.mxu0 %vm619_vm1, %v511_v11  ;;  %65 = vperm.xlu1 %559, %v17_v17   ;;  %v531_v31 = vpack.c.bf16 %v35_v30, %v34_v29  ;;  %v535_v34 = vpack.c.bf16 %v37_v33, %v36_v32  ;;  %v19_v35 = vld [vmem:[%s750_s1 + $0x38] sm:$0xff]  ;;  %v20_v36 = vld [vmem:[%s750_s1 + $0x40] sm:$0x3]  ;;  %v21_v38 = vld [vmem:[%s750_s1 + $0x48] sm:$0x1]  ;;  %s595_s1 = smov [#allocation2]  }
   0xd   :  { %514 = vmatprep.subr.bf16.mxu0 %v588_v2  ;;  %503 = vmatprep.mubr.msk.f32.mxu1 %vm253_vm3, %v19_v35  ;;  %s370_s4 = sshll.u32 %s595_s1, 4  ;;  %s371_s4 = int_to_ptr.vmem [resolvable:$true] %s370_s4 }
   0xe   :  { %s564_s5 = scalar_lea.vmem %s371_s4, 16  ;;  %s568_s6 = scalar_lea.vmem %s371_s4, 32 }
   0xf   :  { %70 = vperm.xlu0 %558, %v18_v19   ;;  %p565_p0 = scmp.ne.s32.totalorder %s371_s4, %s564_s5  ;;  %p569_p1 = scmp.lt.s32.totalorder %s371_s4, %s371_s4 }
  0x10   :  { %560 = vset.pattern.permute.xlu1 %v592_v37  ;;  %p570_p2 = scmp.lt.s32.totalorder %s568_s6, %s564_s5 }
  0x11   :  { %250 = vperm.xlu1 %560, %v20_v36  }
  0x12   :  { %p571_p3 = por %p570_p2, %p569_p1 }
  0x13   :  { %561 = vset.pattern.permute.xlu0 %v592_v37 }
  0x14   :  { %517 = vmatpush3.bf16.xpose.msk.msra.mxu0 %vm619_vm1, %v515_v18  ;;  %245 = vperm.xlu0 %561, %v19_v35   ;;  %p572_p4 = pnand %p571_p3, %p565_p0 }
  0x15   :  { %518 = vmatprep.subr.bf16.mxu0 %v588_v2  ;;  %562 = vset.pattern.permute.xlu1 %v593_v39 }
  0x16   :  { %344 = vperm.xlu1 %562, %v20_v36  }
  0x18   :  { %563 = vset.pattern.permute.xlu0 %v594_v40 }
  0x19   :  { %359 = vperm.xlu0 %563, %v21_v38  }
  0x1a   :  { %340 = vperm.xlu1 %562, %v19_v35  }
  0x1c   :  { %521 = vmatpush3.bf16.xpose.msk.msra.mxu0 %vm619_vm1, %v519_v22 }
  0x1d   :  { %522 = vmatprep.subr.bf16.mxu0 %v588_v2 }
  0x24   :  { %525 = vmatpush3.bf16.xpose.msk.msra.mxu0 %vm619_vm1, %v523_v25 }
  0x25   :  { %526 = vmatprep.subr.bf16.mxu0 %v588_v2 }
  0x2c   :  { %529 = vmatpush3.bf16.xpose.msk.msra.mxu0 %vm619_vm1, %v527_v28 }
  0x2d   :  { %530 = vmatprep.subr.bf16.mxu0 %v588_v2 }
  0x34   :  { %533 = vmatpush3.bf16.xpose.msk.msra.mxu0 %vm619_vm1, %v531_v31 }
  0x35   :  { %534 = vmatprep.subr.bf16.mxu0 %v588_v2 }
  0x3c   :  { %537 = vmatpush3.bf16.xpose.msk.msra.mxu0 %vm619_vm1, %v535_v34 }
  0x43   :  { %469 = vmatmul.mubr.msk.f32.vlgmr.msra.gmra.mrb[0].mxu0 %vm73_vm0, %v12_v9 }
  0x44   :  { %471 = vmatprep.mubr.msk.f32.mxu0 %vm589_vm2, %v590_v5 }
  0x47   :  { %472 = vmatmul.mubr.msk.f32.gmra.mrb[2].mxu0 %vm73_vm0, %v13_v12 }
  0x48   :  { %474 = vmatprep.mubr.msk.f32.mxu0 %vm589_vm2, %v590_v5 }
  0x4b   :  { %475 = vmatmul.mubr.msk.f32.gmra.mrb[4].mxu0 %vm73_vm0, %v14_v10 }
  0x4c   :  { %477 = vmatprep.mubr.msk.f32.mxu0 %vm589_vm2, %v590_v5 }
  0x4f   :  { %478 = vmatmul.mubr.msk.f32.gmra.mrb[6].mxu0 %vm73_vm0, %v15_v13 }
  0x50   :  { %480 = vmatprep.mubr.msk.f32.mxu0 %vm589_vm2, %v590_v5 }
  0x53   :  { %481 = vmatmul.mubr.msk.f32.gmra.mrb[8].mxu0 %vm73_vm0, %v16_v16 }
  0x54   :  { %483 = vmatprep.mubr.msk.f32.mxu0 %vm589_vm2, %v590_v5 }
  0x57   :  { %484 = vmatmul.mubr.msk.f32.gmra.mrb[10].mxu0 %vm73_vm0, %v17_v17 }
  0x58   :  { %486 = vmatprep.mubr.msk.f32.mxu0 %vm589_vm2, %v590_v5 }
  0x5b   :  { %487 = vmatmul.mubr.msk.f32.gmra.mrb[12].mxu0 %vm73_vm0, %v18_v19 }
  0x82   :  { %v41_v41 = vpop.permute.xlu0 %40 }
  0x83   :  { %v51_v49 = vpop.permute.xlu1 %50 }
  0x86   :  { %v46_v45 = vpop.permute.xlu0 %45 }
  0x87   :  { %v56_v56 = vpop.permute.xlu1 %55 }
  0x8a   :  { %v61_v1 = vpop.permute.xlu0 %60 }
  0x8b   :  { %v66_v3 = vpop.permute.xlu1 %65 }
  0x8e   :  { %v71_v9 = vpop.permute.xlu0 %70 }
  0x90   :  { %v251_v15 = vpop.permute.xlu1 %250 }
  0x93   :  { %v246_v17 = vpop.permute.xlu0 %245 }
  0x95   :  { %v345_v16 = vpop.permute.xlu1 %344 }
  0x98   :  { %v360_v34 = vpop.permute.xlu0 %359 }
  0x99   :  { %v341_v25 = vpop.permute.xlu1 %340 }
 0x116   :  { %v202_v42 = vpop.f32.mrb[0].mxu0 }
 0x117   :  { %v470_v43 = vpop.f32.mrb[1].mxu0  ;;  %v203_v44 = vadd.f32 %v202_v42, %v41_v41 }
 0x119   :  { %v236_v50 = vmax.f32 %v203_v44, 0.0 }
 0x11a   :  { %v207_v46 = vpop.f32.mrb[2].mxu0 }
 0x11b   :  { %v208_v47 = vadd.f32 %v207_v46, %v46_v45  ;;  %v473_v48 = vpop.f32.mrb[3].mxu0 }
 0x11d   :  { %v237_v51 = vmax.f32 %v208_v47, 0.0 }
 0x11e   :  { %v212_v52 = vpop.f32.mrb[4].mxu0 }
 0x11f   :  { %v476_v53 = vpop.f32.mrb[5].mxu0  ;;  %v538_v54 = vpack.c.bf16 %v237_v51, %v236_v50  ;;  %v213_v55 = vadd.f32 %v212_v52, %v51_v49 }
 0x121   :  { %539 = vmatprep.subr.bf16.mxu1 %v538_v54  ;;  %v238_v60 = vmax.f32 %v213_v55, 0.0 }
 0x122   :  { %v217_v57 = vpop.f32.mrb[6].mxu0  ;;  %541 = vmatpush3.bf16.msra.mxu1 %v538_v54 }
 0x123   :  { %v218_v58 = vadd.f32 %v217_v57, %v56_v56  ;;  %v479_v59 = vpop.f32.mrb[7].mxu0 }
 0x125   :  { %v239_v61 = vmax.f32 %v218_v58, 0.0 }
 0x126   :  { %v222_v62 = vpop.f32.mrb[8].mxu0 }
 0x127   :  { %v542_v63 = vpack.c.bf16 %v239_v61, %v238_v60  ;;  %v482_v0 = vpop.f32.mrb[9].mxu0  ;;  %v223_v2 = vadd.f32 %v222_v62, %v61_v1 }
 0x129   :  { %543 = vmatprep.subr.bf16.mxu1 %v542_v63  ;;  %v240_v7 = vmax.f32 %v223_v2, 0.0 }
 0x12a   :  { %v227_v4 = vpop.f32.mrb[10].mxu0  ;;  %545 = vmatpush3.bf16.msra.mxu1 %v542_v63 }
 0x12b   :  { %v228_v5 = vadd.f32 %v227_v4, %v66_v3  ;;  %v485_v6 = vpop.f32.mrb[11].mxu0 }
 0x12d   :  { %v241_v8 = vmax.f32 %v228_v5, 0.0 }
 0x12e   :  { %v232_v10 = vpop.f32.mrb[12].mxu0 }
 0x12f   :  { %v546_v11 = vpack.c.bf16 %v241_v8, %v240_v7  ;;  %v233_v12 = vadd.f32 %v232_v10, %v71_v9  ;;  %v488_v13 = vpop.f32.mrb[13].mxu0 }
 0x131   :  { %v242_v14 = vmax.f32 %v233_v12, 0.0  ;;  %547 = vmatprep.subr.bf16.mxu1 %v546_v11 }
 0x132   :  { %549 = vmatpush3.bf16.msra.mxu1 %v546_v11 }
 0x133   :  { %501 = vmatprep.subr.msk.mxu1 %vm258_vm4, %v242_v14 }
 0x136   :  { %502 = vmatpush3.msk.msra.mxu1 %vm258_vm4, %v242_v14 }
 0x137   :  { %504 = vmatmul.mubr.msk.f32.vlgmr.msra.gmra.mrb[0].mxu1 %vm253_vm3, %v20_v36 }
 0x20a   :  { %v505_v18 = vpop.f32.mrb[0].mxu1 }
 0x20b   :  { %v334_v19 = vadd.f32 %v505_v18, %v251_v15  ;;  %v328_v20 = vpop.f32.mrb[1].mxu1 }
 0x20c   :  { %v329_v21 = vadd.f32 %v328_v20, %v246_v17 }
 0x20d   :  { %v338_v22 = vmax.f32 %v334_v19, 0.0 }
 0x20e   :  { %v337_v23 = vmax.f32 %v329_v21, 0.0 }
 0x20f   :  { %v348_v24 = vmul.f32 %v345_v16, %v338_v22 }
 0x210   :  { %v347_v26 = vmul.f32 %v341_v25, %v337_v23 }
 0x211   :  { %v349_v27 = vsel %vm258_vm4, %v348_v24, 0.0 }
 0x212   :  { %v350_v28 = vadd.f32 %v349_v27, %v347_v26 }
 0x214   :  { %v351_v29 = vrot.slane %v350_v28, 4 }
 0x216   :  { %v352_v30 = vadd.f32 %v351_v29, %v350_v28 }
 0x218   :  { %v353_v31 = vrot.slane %v352_v30, 2 }
 0x21a   :  { %v354_v32 = vadd.f32 %v353_v31, %v352_v30 }
 0x21c   :  { %v355_v33 = vrot.slane %v354_v32, 1 }
 0x21e   :  { %v356_v35 = vadd.f32 %v355_v33, %v354_v32 }
 0x220   :  { %v362_v36 = vadd.f32 %v360_v34, %v356_v35 }
 0x222   :  { %363 = vst [vmem:[#allocation2] sm:$0x1] %v362_v36 }
 0x223   :  { %575 = shalt.err (!%p572_p4)
}
 0x224   :  { %s576_s9 = scalar_lea.hbm %s751_s2, 16 }
 0x225   :  { %p577_p5 = scmp.ne.s32.totalorder %s751_s2, %s576_s9  ;;  %p580_p6 = scmp.lt.u32.totalorder %s576_s9, %s751_s2 }
 0x227   :  { %p582_p7 = pnand %p580_p6, %p577_p5 }
 0x229   :  { %585 = shalt.err (!%p582_p7)
}
 0x22a   :  { %373 = dma.vmem_to_hbm [thread:$0]  %s371_s4, 16, %s751_s2, [#allocation3]  }
 0x22b   :  { %586 = dma.done.wait [#allocation3], 16  }
 0x22c   :  { %587 = vsyncadd [#allocation3], 4294967280 }
 0x22d   :  { %377 = vsyncpa [#allocation3], 1 }

</bundles_post_ra>
